<compile_context>
chip_gen: v6e
topology: v6e:2x2x1
jax: 0.10.0
libtpu: 0.0.40
codegen_flags: <defaults>
</compile_context>

<pallas_src>
import functools

import jax
import jax.numpy as jnp
from jax.experimental import pallas as pl
from jax.experimental.pallas import tpu as pltpu


# ---------------------------------------------------------------------------
# Kernels
# ---------------------------------------------------------------------------

def _tgc_banded_kernel(x_ref, w_ref, b_ref, o_ref, *, half_rows):
    """One banded-matmul grid step.

    x_ref: (M*C_in, tile_b)          lane-dense batch tile
    w_ref: (2*M_out*C_out, M*C_in)   banded conv weight, resident in VMEM
    b_ref: (2*M_out*C_out, 1)        bias (lane-broadcast once)
    o_ref: (M_out*C_out, tile_b)     GLU output, one contiguous store
    Row layout of w/b/acc: first half = 'a' gate rows (t-major, c-minor),
    second half = 'g' gate rows, so the GLU split is one aligned sublane slice.
    """
    acc = jnp.dot(w_ref[...], x_ref[...], preferred_element_type=jnp.float32)
    acc = acc + b_ref[...].astype(jnp.float32)
    z = jnp.maximum(acc, 0.0)                      # F.relu (before GLU, as in torch)
    a = z[:half_rows]
    g = z[half_rows:]
    o_ref[...] = (a * jax.nn.sigmoid(g)).astype(o_ref.dtype)   # GLU over channel dim


def _tgc_loop_kernel(x_ref, w_ref, b_ref, o_ref, *, K, M_out, C_in_pad, C_out, stride):
    """Fallback for large M_out / C: one fused (2*C_out, K*C_in_pad) dot per time step.

    C_in is pre-padded to a multiple of 8 in the wrapper so every window slice
    start/length is sublane-aligned (no hidden relayout copies).
    """
    kc = K * C_in_pad
    w = w_ref[...]
    tile_b = x_ref.shape[-1]
    # Hoisted bias lane-broadcast (JAX does not CSE broadcast_in_dim).
    bias_b = jnp.broadcast_to(b_ref[...].astype(jnp.float32), (w.shape[0], tile_b))
    for t in range(M_out):                          # static unroll, static 8-aligned starts
        start = t * stride * C_in_pad
        window = x_ref[pl.ds(start, kc), :]
        acc = jnp.dot(w, window, preferred_element_type=jnp.float32) + bias_b
        z = jnp.maximum(acc, 0.0)
        a = z[:C_out]
        g = z[C_out:]
        o_ref[pl.ds(t * C_out, C_out), :] = (a * jax.nn.sigmoid(g)).astype(o_ref.dtype)


# ---------------------------------------------------------------------------
# Tiling heuristics
# ---------------------------------------------------------------------------

def _device_caps():
    """Per-generation VMEM budget / limit and TensorCore count."""
    kind = ""
    try:
        kind = jax.devices()[0].device_kind.lower()
    except Exception:  # pragma: no cover - defensive; keep conservative defaults
        pass
    is_v7 = ("v7" in kind) or ("7x" in kind)
    if is_v7:
        # 64 MiB physical VMEM, 2 TCs per chip.
        return 20 << 20, 48 << 20, 2
    # v5e / v6e: 128 MiB physical VMEM, 1 TC per chip.
    return 48 << 20, 100 << 20, 1


def _pick_tile_b(B, bytes_per_col, vmem_budget, num_tc):
    """Lane tile: as big as the VMEM budget allows (<=16384), multiple of 128.

    Returns (tile_b, B_pad).  On multi-TC chips the batch axis is padded so the
    grid has >= num_tc equal steps; on single-TC chips a single full-extent tile
    is preferred (per-step overhead dominates, nothing to shard).
    """
    cap = vmem_budget // (2 * max(1, bytes_per_col))      # double-buffered x + out
    cap = max(128, min(16384, (cap // 128) * 128))
    if B <= cap and num_tc <= 1:
        return B, B                                       # one full-extent tile
    tile = cap
    while tile > 128 and pl.cdiv(B, tile) < num_tc:
        tile = max(128, ((tile // 2) // 128) * 128)
    if pl.cdiv(B, tile) == 1:
        return B, B
    B_pad = pl.cdiv(B, tile) * tile
    return tile, B_pad


# ---------------------------------------------------------------------------
# Wrapper
# ---------------------------------------------------------------------------

def temporal_gated_conv(x_in, weight, bias, *, kernel_size, stride=1, tile_b=None):
    """x_in: (N, M, n, C_in); weight: (2*C_out, C_in, K) [torch Conv1d layout]; bias: (2*C_out,)."""
    N, M, n, C_in = x_in.shape
    two_cout, C_in_w, K = weight.shape
    assert C_in_w == C_in and K == kernel_size
    assert two_cout % 2 == 0
    C_out = two_cout // 2
    M_out = (M - K) // stride + 1
    assert M_out >= 1
    B = N * n
    out_rows = M_out * C_out
    dtype = x_in.dtype
    itemsize = jnp.dtype(dtype).itemsize

    vmem_budget, vmem_limit, num_tc = _device_caps()

    # Banded path: single MXU tile covers all time steps.
    use_banded = (M_out * two_cout <= 128) and (M * C_in <= 128)

    if use_banded:
        rows_in = M * C_in
        # 'N M n c -> (N n) c M' as 2-D rows (m*C_in + c), lanes = B.
        x2d = jnp.transpose(x_in, (1, 3, 0, 2)).reshape(rows_in, B)
        # Fused per-step weight: w_k[o, k*C_in + c] = weight[o, c, k]
        w_k = jnp.transpose(weight, (0, 2, 1)).reshape(two_cout, K * C_in)
        # Banded weight, rows grouped by gate half then (t, c_out).
        W_big = jnp.zeros((2, M_out, C_out, rows_in), dtype=weight.dtype)
        for t in range(M_out):
            c0 = t * stride * C_in
            W_big = W_big.at[0, t, :, c0:c0 + K * C_in].set(w_k[:C_out])
            W_big = W_big.at[1, t, :, c0:c0 + K * C_in].set(w_k[C_out:])
        w_arr = W_big.reshape(2 * out_rows, rows_in)
        b_arr = jnp.concatenate(
            [jnp.tile(bias[:C_out], M_out), jnp.tile(bias[C_out:], M_out)]
        ).reshape(2 * out_rows, 1)
        w_rows, w_cols = 2 * out_rows, rows_in
        kern = functools.partial(_tgc_banded_kernel, half_rows=out_rows)
    else:
        # Generic path: per-time-step loop; pad C_in to the sublane (8) so every
        # window slice is aligned.
        C_in_pad = ((C_in + 7) // 8) * 8
        rows_in = M * C_in_pad
        x4 = jnp.transpose(x_in, (1, 3, 0, 2))                       # (M, C_in, N, n)
        x4 = jnp.pad(x4, ((0, 0), (0, C_in_pad - C_in), (0, 0), (0, 0)))
        x2d = x4.reshape(rows_in, B)
        w_arr = jnp.pad(jnp.transpose(weight, (0, 2, 1)),
                        ((0, 0), (0, 0), (0, C_in_pad - C_in))
                        ).reshape(two_cout, K * C_in_pad)
        b_arr = bias.reshape(two_cout, 1)
        w_rows, w_cols = two_cout, K * C_in_pad
        kern = functools.partial(_tgc_loop_kernel, K=K, M_out=M_out,
                                 C_in_pad=C_in_pad, C_out=C_out, stride=stride)

    bytes_per_col = (rows_in + out_rows) * itemsize
    if tile_b is None:
        tile_b, B_pad = _pick_tile_b(B, bytes_per_col, vmem_budget, num_tc)
    else:
        assert tile_b == B or tile_b % 128 == 0, \
            "lane tile must be a multiple of 128 or the full B"
        B_pad = pl.cdiv(B, tile_b) * tile_b

    if B_pad > B:
        x2d = jnp.pad(x2d, ((0, 0), (0, B_pad - B)))   # padded lanes sliced off below
    grid = (B_pad // tile_b,)

    cost = pl.CostEstimate(
        flops=2 * B * two_cout * K * C_in * M_out,
        transcendentals=B * C_out * M_out,
        bytes_accessed=(x2d.size + B_pad * out_rows) * itemsize
                       + (w_arr.size + b_arr.size) * itemsize,
    )

    out2d = pl.pallas_call(
        kern,
        out_shape=jax.ShapeDtypeStruct((out_rows, B_pad), dtype),
        grid_spec=pltpu.PrefetchScalarGridSpec(
            num_scalar_prefetch=0,
            grid=grid,
            in_specs=[
                pl.BlockSpec((rows_in, tile_b), lambda i: (0, i)),
                pl.BlockSpec((w_rows, w_cols), lambda i: (0, 0)),   # resident weight
                pl.BlockSpec((w_rows, 1), lambda i: (0, 0)),        # resident bias
            ],
            out_specs=pl.BlockSpec((out_rows, tile_b), lambda i: (0, i)),
        ),
        compiler_params=pltpu.CompilerParams(
            dimension_semantics=("parallel",),
            vmem_limit_bytes=vmem_limit,
        ),
        cost_estimate=cost,
    )(x2d, w_arr, b_arr)

    out2d = out2d[:, :B]                              # drop lane padding
    # rows are (t, c_out); '(N n) c M -> N M n c'
    return jnp.transpose(out2d.reshape(M_out, C_out, N, n), (2, 0, 3, 1))


# ---------------------------------------------------------------------------
# Pure-JAX reference (matches the PyTorch module exactly)
# ---------------------------------------------------------------------------

def temporal_gated_conv_ref(x_in, weight, bias, *, kernel_size, stride=1):
    N, M, n, C_in = x_in.shape
    two_cout, _, K = weight.shape
    C_out = two_cout // 2
    M_out = (M - K) // stride + 1
    # 'N M n c -> (N n) c M'
    x = jnp.transpose(x_in, (0, 2, 3, 1)).reshape(N * n, C_in, M)
    outs = []
    for t in range(M_out):
        window = x[:, :, t * stride:t * stride + K]                  # (B, C_in, K)
        outs.append(
            jnp.einsum("bck,ock->bo", window, weight,
                       precision=jax.lax.Precision.HIGHEST) + bias
        )
    y = jnp.stack(outs, axis=-1)                                     # (B, 2*C_out, M_out)
    y = jnp.maximum(y, 0.0)                                          # relu
    a, g = y[:, :C_out, :], y[:, C_out:, :]
    y = a * jax.nn.sigmoid(g)                                        # glu(dim=1)
    # '(N n) c M -> N M n c'
    return y.reshape(N, n, C_out, M_out).transpose(0, 3, 1, 2)


if __name__ == "__main__":
    # Small but representative STGCN shapes: N=2 batches, M=8 time steps,
    # n=128 graph nodes (-> B = 256 lane-dense columns), C_in=4,
    # out_channels=8, kernel_size=3, stride=1.
    N, M, n, C_in = 2, 8, 128, 4
    C_out, K, stride = 8, 3, 1

    key = jax.random.PRNGKey(0)
    k1, k2, k3 = jax.random.split(key, 3)
    x_in = jax.random.normal(k1, (N, M, n, C_in), dtype=jnp.float32)

    # Deterministic Conv1d-style init: U(-1/sqrt(fan_in), 1/sqrt(fan_in))
    bound = 1.0 / (C_in * K) ** 0.5
    weight = jax.random.uniform(k2, (2 * C_out, C_in, K),
                                minval=-bound, maxval=bound, dtype=jnp.float32)
    bias = jax.random.uniform(k3, (2 * C_out,),
                              minval=-bound, maxval=bound, dtype=jnp.float32)

    out = temporal_gated_conv(x_in, weight, bias, kernel_size=K, stride=stride)
    out = jax.block_until_ready(out)

    ref = temporal_gated_conv_ref(x_in, weight, bias, kernel_size=K, stride=stride)
    assert out.shape == (N, (M - K) // stride + 1, n, C_out), out.shape
    # Native (default-precision) MXU path rounds matmul operands to bf16 while
    # accumulating in f32; compare against the f32 HIGHEST-precision reference
    # with a tolerance covering that rounding.
    max_err = float(jnp.max(jnp.abs(out - ref)))
    assert jnp.allclose(out, ref, atol=3e-2, rtol=3e-2), f"max abs err {max_err}"
    print("KERNEL_OK")
</pallas_src>

<mosaic_0001>
module attributes {stable_mosaic.version = 11 : i64} {
  func.func @_tgc_banded_kernel(%arg0: i32, %arg1: memref<32x256xf32, #tpu.memory_space<vmem>>, %arg2: memref<96x32xf32, #tpu.memory_space<vmem>>, %arg3: memref<96x1xf32, #tpu.memory_space<vmem>>, %arg4: memref<48x256xf32, #tpu.memory_space<vmem>>) attributes {dimension_semantics = [#tpu.dimension_semantics<parallel>], iteration_bounds = array<i64: 1>, scalar_prefetch = 0 : i64, scratch_operands = 0 : i64, tpu.core_type = #tpu.core_type<tc>, window_params = [{transform_indices = @transform_0, window_bounds = array<i64: 32, 256>}, {pipeline_mode = #tpu.pipeline_mode<synchronous>, transform_indices = @transform_1, window_bounds = array<i64: 96, 32>}, {pipeline_mode = #tpu.pipeline_mode<synchronous>, transform_indices = @transform_2, window_bounds = array<i64: 96, 1>}, {transform_indices = @transform_3, window_bounds = array<i64: 48, 256>}]} {
    %c0 = arith.constant 0 : index
    %c0_0 = arith.constant 0 : index
    %0 = vector.load %arg2[%c0, %c0_0] : memref<96x32xf32, #tpu.memory_space<vmem>>, vector<96x32xf32>
    %c0_1 = arith.constant 0 : index
    %c0_2 = arith.constant 0 : index
    %1 = vector.load %arg1[%c0_1, %c0_2] : memref<32x256xf32, #tpu.memory_space<vmem>>, vector<32x256xf32>
    %cst = arith.constant dense<0.000000e+00> : vector<96x256xf32>
    %2 = tpu.matmul %0, %1, %cst {dimension_numbers = #tpu.dot_dimension_numbers<[1], [0], [0], [1], [0, 0, 1, 1], [], []>} : vector<96x32xf32>, vector<32x256xf32>, vector<96x256xf32> -> vector<96x256xf32>
    %c0_3 = arith.constant 0 : index
    %c0_4 = arith.constant 0 : index
    %3 = vector.load %arg3[%c0_3, %c0_4] : memref<96x1xf32, #tpu.memory_space<vmem>>, vector<96x1xf32>
    %4 = vector.broadcast %3 : vector<96x1xf32> to vector<96x256xf32>
    %5 = arith.addf %2, %4 : vector<96x256xf32>
    %cst_5 = arith.constant 0.000000e+00 : f32
    %6 = vector.broadcast %cst_5 : f32 to vector<96x256xf32>
    %7 = arith.maximumf %5, %6 : vector<96x256xf32>
    %8 = vector.extract_strided_slice %7 {offsets = [0, 0], sizes = [48, 256], strides = [1, 1]} : vector<96x256xf32> to vector<48x256xf32>
    %9 = vector.extract_strided_slice %7 {offsets = [48, 0], sizes = [48, 256], strides = [1, 1]} : vector<96x256xf32> to vector<48x256xf32>
    %10 = arith.negf %9 : vector<48x256xf32>
    %11 = math.exp %10 : vector<48x256xf32>
    %cst_6 = arith.constant 1.000000e+00 : f32
    %12 = vector.broadcast %cst_6 : f32 to vector<48x256xf32>
    %13 = arith.addf %12, %11 : vector<48x256xf32>
    %14 = arith.divf %12, %13 : vector<48x256xf32>
    %15 = arith.mulf %8, %14 : vector<48x256xf32>
    %c0_7 = arith.constant 0 : index
    %c0_8 = arith.constant 0 : index
    %16 = vector.load %arg4[%c0_7, %c0_8] : memref<48x256xf32, #tpu.memory_space<vmem>>, vector<48x256xf32>
    tpu.vector_store %arg4[%c0_7, %c0_8], %15 {strides = array<i32>} : memref<48x256xf32, #tpu.memory_space<vmem>>, vector<48x256xf32>,
    return
  }
  func.func @transform_0(%arg0: i32) -> (i32, i32) {
    %c0_i32 = arith.constant 0 : i32
    %c0_i32_0 = arith.constant 0 : i32
    return %c0_i32, %arg0 : i32, i32
  }
  func.func @transform_1(%arg0: i32) -> (i32, i32) {
    %c0_i32 = arith.constant 0 : i32
    %c0_i32_0 = arith.constant 0 : i32
    %c0_i32_1 = arith.constant 0 : i32
    return %c0_i32, %c0_i32_0 : i32, i32
  }
  func.func @transform_2(%arg0: i32) -> (i32, i32) {
    %c0_i32 = arith.constant 0 : i32
    %c0_i32_0 = arith.constant 0 : i32
    %c0_i32_1 = arith.constant 0 : i32
    return %c0_i32, %c0_i32_0 : i32, i32
  }
  func.func @transform_3(%arg0: i32) -> (i32, i32) {
    %c0_i32 = arith.constant 0 : i32
    %c0_i32_0 = arith.constant 0 : i32
    return %c0_i32, %arg0 : i32, i32
  }
}

</mosaic_0001>

<bundles_post_ra>
// kernel: tpu_custom_call.1
= control target key start
LH: loop header
LB: loop body
LE: loop exit
PB: predicated region body
PF: predicated region fallthrough
CT: control target
= control target key end

     0   :  { %vm107_vm0 = vcmask 261120   ;;  %v526_v10 = vmov 0.0   ;;  %s665_s0 = inlined_call_operand.vmem [shape: f32[32,256], index: 0, kind: input, shape index: {}]   ;;  %s666_s1 = inlined_call_operand.vmem [shape: f32[96,32], index: 1, kind: input, shape index: {}]   ;;  %s667_s2 = inlined_call_operand.vmem [shape: f32[96,1], index: 2, kind: input, shape index: {}]   ;;  %s668_s3 = inlined_call_operand.hbm [shape: f32[48,256], index: 3, kind: output, shape index: {}]  }
   0x1   :  { %v34_v0 = vld [vmem:[%s665_s0 + $0x38] sm:$0xff]  ;;  %v33_v1 = vld [vmem:[%s665_s0 + $0x30] sm:$0xff]  ;;  %v32_v2 = vld [vmem:[%s665_s0 + $0x28] sm:$0xff]  ;;  %208 = vmatprep.mubr.f32.mxu0 %v526_v10  ;;  %244 = vmatprep.mubr.f32.mxu1 %v526_v10 }
   0x2   :  { %168 = vmatprep.subr.mxu0 %v34_v0  ;;  %441 = vmatprep.subr.mxu1 %v34_v0  ;;  %v31_v3 = vld [vmem:[%s665_s0 + $0x20] sm:$0xff]  ;;  %v30_v4 = vld [vmem:[%s665_s0 + $0x18] sm:$0xff]  ;;  %v29_v5 = vld [vmem:[%s665_s0 + $0x10] sm:$0xff] }
   0x3   :  { %169 = vmatpush1.msra.mxu0 %v33_v1  ;;  %445 = vmatpush1.msra.mxu1 %v33_v1  ;;  %v28_v6 = vld [vmem:[%s665_s0 + $0x8] sm:$0xff]  ;;  %v27_v7 = vld [vmem:[%s665_s0] sm:$0xff]  ;;  %v21_v9 = vld [vmem:[%s666_s1 + $0x30] sm:$0xff] }
   0x4   :  { %170 = vmatprep.subr.mxu0 %v32_v2  ;;  %442 = vmatprep.subr.mxu1 %v32_v2  ;;  %v15_v8 = vld [vmem:[%s666_s1] sm:$0xff]  ;;  %v41_v12 = vld [vmem:[%s667_s2 + $0x30] sm:$0xff] }
   0x5   :  { %171 = vmatpush1.msra.mxu0 %v31_v3  ;;  %446 = vmatpush1.msra.mxu1 %v31_v3  ;;  %v43_v11 = vld [vmem:[%s667_s2 + $0x40] sm:$0xff] }
   0x6   :  { %172 = vmatprep.subr.mxu0 %v30_v4  ;;  %443 = vmatprep.subr.mxu1 %v30_v4 }
   0x7   :  { %173 = vmatpush1.msra.mxu0 %v29_v5  ;;  %447 = vmatpush1.msra.mxu1 %v29_v5 }
   0x8   :  { %174 = vmatprep.subr.mxu0 %v28_v6  ;;  %444 = vmatprep.subr.mxu1 %v28_v6 }
   0x9   :  { %175 = vmatpush1.msra.mxu0 %v27_v7  ;;  %448 = vmatpush1.msra.mxu1 %v27_v7 }
   0xa   :  { %417 = vmatmul.mubr.msk.f32.vlgmr.msra.gmra.mxu0 %vm107_vm0, %v15_v8  ;;  %423 = vmatmul.mubr.msk.f32.vlgmr.msra.gmra.mxu1 %vm107_vm0, %v21_v9 }
   0xb   :  { %8 = vsyncpa [#allocation3], 0  ;;  %214 = vmatprep.mubr.f32.mxu0 %v526_v10  ;;  %250 = vmatprep.mubr.f32.mxu1 %v526_v10  ;;  %v16_v13 = vld [vmem:[%s666_s1 + $0x8] sm:$0xff]  ;;  %v22_v14 = vld [vmem:[%s666_s1 + $0x38] sm:$0xff]  ;;  %v527_v15 = vmov 0  }
   0xc   :  { %455 = vset.pattern.permute.xlu1 %v527_v15  ;;  %454 = vset.pattern.permute.xlu0 %v527_v15  ;;  %v44_v16 = vld [vmem:[%s667_s2 + $0x48] sm:$0xff]  ;;  %v42_v17 = vld [vmem:[%s667_s2 + $0x38] sm:$0xff]  ;;  %v17_v18 = vld [vmem:[%s666_s1 + $0x10] sm:$0xff] }
   0xd   :  { %89 = vperm.xlu1 %455, %v43_v11   ;;  %79 = vperm.xlu0 %454, %v41_v12   ;;  %v23_v19 = vld [vmem:[%s666_s1 + $0x40] sm:$0xff]  ;;  %v46_v20 = vld [vmem:[%s667_s2 + $0x58] sm:$0xff]  ;;  %v45_v21 = vld [vmem:[%s667_s2 + $0x50] sm:$0xff] }
   0xe   :  { %418 = vmatmul.mubr.msk.f32.gmra.mxu0 %vm107_vm0, %v16_v13  ;;  %424 = vmatmul.mubr.msk.f32.gmra.mxu1 %vm107_vm0, %v22_v14  ;;  %v18_v22 = vld [vmem:[%s666_s1 + $0x18] sm:$0xff]  ;;  %v24_v23 = vld [vmem:[%s666_s1 + $0x48] sm:$0xff]  ;;  %v35_v25 = vld [vmem:[%s667_s2] sm:$0xff] }
   0xf   :  { %220 = vmatprep.mubr.f32.mxu0 %v526_v10  ;;  %256 = vmatprep.mubr.f32.mxu1 %v526_v10  ;;  %v36_v24 = vld [vmem:[%s667_s2 + $0x8] sm:$0xff]  ;;  %v19_v26 = vld [vmem:[%s666_s1 + $0x20] sm:$0xff]  ;;  %v25_v27 = vld [vmem:[%s666_s1 + $0x50] sm:$0xff] }
  0x10   :  { %v38_v28 = vld [vmem:[%s667_s2 + $0x18] sm:$0xff]  ;;  %v37_v29 = vld [vmem:[%s667_s2 + $0x10] sm:$0xff]  ;;  %v20_v30 = vld [vmem:[%s666_s1 + $0x28] sm:$0xff] }
  0x11   :  { %94 = vperm.xlu1 %455, %v44_v16   ;;  %84 = vperm.xlu0 %454, %v42_v17   ;;  %v26_v31 = vld [vmem:[%s666_s1 + $0x58] sm:$0xff]  ;;  %v40_v32 = vld [vmem:[%s667_s2 + $0x28] sm:$0xff]  ;;  %v39_v33 = vld [vmem:[%s667_s2 + $0x20] sm:$0xff]  ;;  %s528_s1 = smov [#allocation2]  }
  0x12   :  { %419 = vmatmul.mubr.msk.f32.gmra.mxu0 %vm107_vm0, %v17_v18  ;;  %425 = vmatmul.mubr.msk.f32.gmra.mxu1 %vm107_vm0, %v23_v19  ;;  %s406_s2 = sshll.u32 %s528_s1, 4  ;;  %s407_s2 = int_to_ptr.vmem [resolvable:$true] %s406_s2 }
  0x13   :  { %226 = vmatprep.mubr.f32.mxu0 %v526_v10  ;;  %262 = vmatprep.mubr.f32.mxu1 %v526_v10  ;;  %s504_s20 = scalar_lea.vmem %s407_s2, 1536  ;;  %p509_p1 = scmp.lt.s32.totalorder %s407_s2, %s407_s2 }
  0x14   :  { %p505_p0 = scmp.ne.s32.totalorder %s407_s2, %s504_s20  ;;  %p510_p2 = scmp.lt.s32.totalorder %s504_s20, %s504_s20 }
  0x15   :  { %104 = vperm.xlu1 %455, %v46_v20   ;;  %99 = vperm.xlu0 %454, %v45_v21  }
  0x16   :  { %420 = vmatmul.mubr.msk.f32.gmra.mxu0 %vm107_vm0, %v18_v22  ;;  %426 = vmatmul.mubr.msk.f32.gmra.mxu1 %vm107_vm0, %v24_v23  ;;  %p511_p3 = por %p510_p2, %p509_p1 }
  0x17   :  { %232 = vmatprep.mubr.f32.mxu0 %v526_v10  ;;  %268 = vmatprep.mubr.f32.mxu1 %v526_v10 }
  0x18   :  { %p512_p4 = pnand %p511_p3, %p505_p0 }
  0x19   :  { %54 = vperm.xlu1 %455, %v36_v24   ;;  %49 = vperm.xlu0 %454, %v35_v25  }
  0x1a   :  { %421 = vmatmul.mubr.msk.f32.gmra.mxu0 %vm107_vm0, %v19_v26  ;;  %427 = vmatmul.mubr.msk.f32.gmra.mxu1 %vm107_vm0, %v25_v27 }
  0x1b   :  { %238 = vmatprep.mubr.f32.mxu0 %v526_v10  ;;  %274 = vmatprep.mubr.f32.mxu1 %v526_v10 }
  0x1d   :  { %64 = vperm.xlu1 %455, %v38_v28   ;;  %59 = vperm.xlu0 %454, %v37_v29  }
  0x1e   :  { %422 = vmatmul.mubr.msk.f32.gmra.mxu0 %vm107_vm0, %v20_v30  ;;  %428 = vmatmul.mubr.msk.f32.gmra.mxu1 %vm107_vm0, %v26_v31 }
  0x21   :  { %74 = vperm.xlu1 %455, %v40_v32   ;;  %69 = vperm.xlu0 %454, %v39_v33  }
  0x88   :  { %v80_v34 = vpop.permute.xlu0 %79  ;;  %v90_v45 = vpop.permute.xlu1 %89 }
  0x8c   :  { %v85_v40 = vpop.permute.xlu0 %84  ;;  %v95_v57 = vpop.permute.xlu1 %94 }
  0x90   :  { %v100_v3 = vpop.permute.xlu0 %99  ;;  %v105_v18 = vpop.permute.xlu1 %104 }
  0xca   :  { %v246_v35 = vpop.f32.mrf.mxu1  ;;  %v659_v51 = vpop.f32.mrf.mxu0 }
  0xcb   :  { %v247_v36 = vadd.f32 %v246_v35, %v80_v34 }
  0xcc   :  { %v248_v37 = vpop.f32.mrf.mxu1  ;;  %v212_v61 = vpop.f32.mrf.mxu0 }
  0xcd   :  { %v293_v38 = vmax.f32 %v247_v36, 0.0  ;;  %v249_v39 = vadd.f32 %v248_v37, %v80_v34 }
  0xce   :  { %v252_v41 = vpop.f32.mrf.mxu1  ;;  %v216_v7 = vpop.f32.mrf.mxu0 }
  0xcf   :  { %v429_v42 = vmul.f32 -1.442695, %v293_v38  ;;  %v294_v43 = vmax.f32 %v249_v39, 0.0  ;;  %v253_v44 = vadd.f32 %v252_v41, %v85_v40 }
  0xd0   :  { %v254_v46 = vpop.f32.mrf.mxu1  ;;  %v218_v19 = vpop.f32.mrf.mxu0 }
  0xd1   :  { %456 = vpow2.f32 %v429_v42  ;;  %v430_v47 = vmul.f32 -1.442695, %v294_v43  ;;  %v295_v48 = vmax.f32 %v253_v44, 0.0  ;;  %v255_v49 = vadd.f32 %v254_v46, %v85_v40  ;;  %v50_v40 = vpop.permute.xlu0 %49 }
  0xd2   :  { %v258_v50 = vpop.f32.mrf.mxu1  ;;  %v222_v31 = vpop.f32.mrf.mxu0  ;;  %v211_v42 = vadd.f32 %v659_v51, %v50_v40 }
  0xd3   :  { %458 = vpow2.f32 %v430_v47  ;;  %v431_v52 = vmul.f32 -1.442695, %v295_v48  ;;  %v259_v53 = vadd.f32 %v258_v50, %v90_v45  ;;  %v296_v54 = vmax.f32 %v255_v49, 0.0  ;;  %v55_v48 = vpop.permute.xlu1 %54 }
  0xd4   :  { %v260_v55 = vpop.f32.mrf.mxu1  ;;  %v224_v39 = vpop.f32.mrf.mxu0  ;;  %v217_v50 = vadd.f32 %v216_v7, %v55_v48 }
  0xd5   :  { %460 = vpow2.f32 %v431_v52  ;;  %v297_v56 = vmax.f32 %v259_v53, 0.0  ;;  %v432_v58 = vmul.f32 -1.442695, %v296_v54  ;;  %v261_v59 = vadd.f32 %v260_v55, %v90_v45 }
  0xd6   :  { %v264_v60 = vpop.f32.mrf.mxu1  ;;  %v213_v45 = vadd.f32 %v212_v61, %v50_v40  ;;  %v228_v46 = vpop.f32.mrf.mxu0  ;;  %v281_v52 = vmax.f32 %v211_v42, 0.0 }
  0xd7   :  { %v433_v62 = vmul.f32 -1.442695, %v297_v56  ;;  %v265_v63 = vadd.f32 %v264_v60, %v95_v57  ;;  %462 = vpow2.f32 %v432_v58  ;;  %v298_v0 = vmax.f32 %v261_v59, 0.0  ;;  %v60_v60 = vpop.permute.xlu0 %59 }
  0xd8   :  { %v266_v1 = vpop.f32.mrf.mxu1  ;;  %v282_v56 = vmax.f32 %v213_v45, 0.0  ;;  %v230_v58 = vpop.f32.mrf.mxu0  ;;  %v219_v59 = vadd.f32 %v218_v19, %v55_v48 }
  0xd9   :  { %464 = vpow2.f32 %v433_v62  ;;  %v299_v2 = vmax.f32 %v265_v63, 0.0  ;;  %v434_v4 = vmul.f32 -1.442695, %v298_v0  ;;  %v267_v5 = vadd.f32 %v266_v1, %v95_v57 }
  0xda   :  { %v270_v6 = vpop.f32.mrf.mxu1  ;;  %v283_v63 = vmax.f32 %v217_v50, 0.0  ;;  %v223_v1 = vadd.f32 %v222_v31, %v60_v60  ;;  %v284_v7 = vmax.f32 %v219_v59, 0.0 }
  0xdb   :  { %v435_v8 = vmul.f32 -1.442695, %v299_v2  ;;  %v271_v9 = vadd.f32 %v270_v6, %v100_v3  ;;  %466 = vpow2.f32 %v434_v4  ;;  %v300_v10 = vmax.f32 %v267_v5, 0.0  ;;  %v234_v6 = vpop.f32.mrf.mxu0 }
  0xdc   :  { %v272_v11 = vpop.f32.mrf.mxu1 }
  0xdd   :  { %468 = vpow2.f32 %v435_v8  ;;  %v301_v12 = vmax.f32 %v271_v9, 0.0  ;;  %v436_v14 = vmul.f32 -1.442695, %v300_v10  ;;  %v273_v15 = vadd.f32 %v272_v11, %v100_v3  ;;  %v65_v8 = vpop.permute.xlu1 %64 }
  0xde   :  { %v457_v13 = vpop.eup %456  ;;  %v276_v16 = vpop.f32.mrf.mxu1  ;;  %v225_v9 = vadd.f32 %v224_v39, %v60_v60 }
  0xdf   :  { %v341_v17 = vadd.f32 1.0, %v457_v13  ;;  %v437_v20 = vmul.f32 -1.442695, %v301_v12  ;;  %470 = vpow2.f32 %v436_v14  ;;  %v302_v22 = vmax.f32 %v273_v15, 0.0 }
  0xe0   :  { %v459_v21 = vpop.eup %458  ;;  %v277_v23 = vadd.f32 %v276_v16, %v105_v18  ;;  %v278_v24 = vpop.f32.mrf.mxu1  ;;  %v285_v12 = vmax.f32 %v223_v1, 0.0  ;;  %v229_v13 = vadd.f32 %v228_v46, %v65_v8  ;;  %v286_v19 = vmax.f32 %v225_v9, 0.0 }
  0xe1   :  { %472 = vrcp.f32 %v341_v17  ;;  %v342_v25 = vadd.f32 1.0, %v459_v21  ;;  %v438_v27 = vmul.f32 -1.442695, %v302_v22  ;;  %v279_v29 = vadd.f32 %v278_v24, %v105_v18  ;;  %v236_v18 = vpop.f32.mrf.mxu0  ;;  %v70_v24 = vpop.permute.xlu0 %69 }
  0xe2   :  { %v461_v26 = vpop.eup %460  ;;  %474 = vpow2.f32 %v437_v20  ;;  %v303_v28 = vmax.f32 %v277_v23, 0.0  ;;  %v231_v20 = vadd.f32 %v230_v58, %v65_v8  ;;  %v287_v23 = vmax.f32 %v229_v13, 0.0 }
  0xe3   :  { %476 = vrcp.f32 %v342_v25  ;;  %v343_v30 = vadd.f32 1.0, %v461_v26  ;;  %v304_v33 = vmax.f32 %v279_v29, 0.0  ;;  %v240_v29 = vpop.f32.mrf.mxu0  ;;  %v237_v31 = vadd.f32 %v236_v18, %v70_v24 }
  0xe4   :  { %478 = vpow2.f32 %v438_v27  ;;  %v439_v32 = vmul.f32 -1.442695, %v303_v28  ;;  %v463_v34 = vpop.eup %462  ;;  %v235_v27 = vadd.f32 %v234_v6, %v70_v24 }
  0xe5   :  { %480 = vrcp.f32 %v343_v30  ;;  %v344_v36 = vadd.f32 1.0, %v463_v34  ;;  %v440_v37 = vmul.f32 -1.442695, %v304_v33  ;;  %v288_v30 = vmax.f32 %v231_v20, 0.0  ;;  %v75_v33 = vpop.permute.xlu1 %74 }
  0xe6   :  { %v465_v35 = vpop.eup %464  ;;  %482 = vpow2.f32 %v439_v32  ;;  %v290_v40 = vmax.f32 %v237_v31, 0.0 }
  0xe7   :  { %v345_v38 = vadd.f32 1.0, %v465_v35  ;;  %484 = vrcp.f32 %v344_v36  ;;  %v289_v35 = vmax.f32 %v235_v27, 0.0  ;;  %v241_v36 = vadd.f32 %v240_v29, %v75_v33 }
  0xe8   :  { %v467_v41 = vpop.eup %466 }
  0xe9   :  { %486 = vrcp.f32 %v345_v38  ;;  %v346_v44 = vadd.f32 1.0, %v467_v41  ;;  %v242_v38 = vpop.f32.mrf.mxu0 }
  0xea   :  { %v469_v43 = vpop.eup %468  ;;  %488 = vpow2.f32 %v440_v37 }
  0xeb   :  { %v347_v47 = vadd.f32 1.0, %v469_v43  ;;  %490 = vrcp.f32 %v346_v44  ;;  %v291_v43 = vmax.f32 %v241_v36, 0.0  ;;  %v243_v44 = vadd.f32 %v242_v38, %v75_v33 }
  0xec   :  { %v471_v49 = vpop.eup %470 }
  0xed   :  { %492 = vrcp.f32 %v347_v47  ;;  %v348_v54 = vadd.f32 1.0, %v471_v49  ;;  %v292_v47 = vmax.f32 %v243_v44, 0.0 }
  0xee   :  { %v473_v53 = vpop.eup %472 }
  0xef   :  { %v475_v55 = vpop.eup %474  ;;  %v377_v57 = vmul.f32 %v473_v53, %v281_v52  ;;  %494 = vrcp.f32 %v348_v54 }
  0xf0   :  { %v477_v51 = vpop.eup %476  ;;  %v349_v62 = vadd.f32 1.0, %v475_v55 }
  0xf1   :  { %v479_v61 = vpop.eup %478  ;;  %v378_v0 = vmul.f32 %v477_v51, %v282_v56  ;;  %389 = vst [vmem:[#allocation2] sm:$0xff] %v377_v57 }
  0xf2   :  { %v481_v2 = vpop.eup %480  ;;  %496 = vrcp.f32 %v349_v62  ;;  %v350_v3 = vadd.f32 1.0, %v479_v61 }
  0xf3   :  { %v483_v4 = vpop.eup %482  ;;  %v379_v5 = vmul.f32 %v481_v2, %v283_v63  ;;  %390 = vst [vmem:[#allocation2 + $0x8] sm:$0xff] %v378_v0 }
  0xf4   :  { %498 = vrcp.f32 %v350_v3  ;;  %v351_v10 = vadd.f32 1.0, %v483_v4  ;;  %v485_v11 = vpop.eup %484 }
  0xf5   :  { %391 = vst [vmem:[#allocation2 + $0x10] sm:$0xff] %v379_v5  ;;  %v380_v15 = vmul.f32 %v485_v11, %v284_v7 }
  0xf6   :  { %v487_v14 = vpop.eup %486  ;;  %500 = vrcp.f32 %v351_v10 }
  0xf7   :  { %v489_v16 = vpop.eup %488  ;;  %v381_v17 = vmul.f32 %v487_v14, %v285_v12  ;;  %392 = vst [vmem:[#allocation2 + $0x18] sm:$0xff] %v380_v15 }
  0xf8   :  { %v352_v21 = vadd.f32 1.0, %v489_v16  ;;  %v491_v22 = vpop.eup %490 }
  0xf9   :  { %393 = vst [vmem:[#allocation2 + $0x20] sm:$0xff] %v381_v17  ;;  %v382_v26 = vmul.f32 %v491_v22, %v286_v19 }
  0xfa   :  { %v493_v25 = vpop.eup %492  ;;  %502 = vrcp.f32 %v352_v21 }
  0xfb   :  { %v383_v28 = vmul.f32 %v493_v25, %v287_v23  ;;  %394 = vst [vmem:[#allocation2 + $0x28] sm:$0xff] %v382_v26 }
  0xfc   :  { %v495_v32 = vpop.eup %494 }
  0xfd   :  { %395 = vst [vmem:[#allocation2 + $0x30] sm:$0xff] %v383_v28  ;;  %v384_v34 = vmul.f32 %v495_v32, %v288_v30 }
  0xff   :  { %v497_v37 = vpop.eup %496  ;;  %396 = vst [vmem:[#allocation2 + $0x38] sm:$0xff] %v384_v34 }
 0x100   :  { %v385_v39 = vmul.f32 %v497_v37, %v289_v35 }
 0x101   :  { %v499_v41 = vpop.eup %498 }
 0x102   :  { %397 = vst [vmem:[#allocation2 + $0x40] sm:$0xff] %v385_v39  ;;  %v386_v42 = vmul.f32 %v499_v41, %v290_v40 }
 0x103   :  { %v501_v45 = vpop.eup %500 }
 0x104   :  { %398 = vst [vmem:[#allocation2 + $0x48] sm:$0xff] %v386_v42  ;;  %v387_v46 = vmul.f32 %v501_v45, %v291_v43 }
 0x106   :  { %399 = vst [vmem:[#allocation2 + $0x50] sm:$0xff] %v387_v46 }
 0x107   :  { %v503_v48 = vpop.eup %502 }
 0x108   :  { %v388_v49 = vmul.f32 %v503_v48, %v292_v47 }
 0x10a   :  { %400 = vst [vmem:[#allocation2 + $0x58] sm:$0xff] %v388_v49 }
 0x10b   :  { %515 = shalt.err (!%p512_p4)
}
 0x10c   :  { %s529_s21 = smov 256   ;;  %s530_s22 = smov 16  }
 0x10d   :  { %412 = dma.vmem_to_hbm [thread:$0]  %s407_s2, 1536, %s668_s3, [#allocation3], %s529_s21, %s529_s21, %s530_s22  }
 0x10e   :  { %524 = dma.done.wait [#allocation3], 1536  }
 0x10f   :  { %525 = vsyncadd [#allocation3], 4294965760 }
 0x110   :  { %416 = vsyncpa [#allocation3], 1 }

</bundles_post_ra>
